<compile_context>
chip_gen: v7x
topology: tpu7x:2x2x1
jax: 0.10.0
libtpu: 0.0.40
codegen_flags: <defaults>
</compile_context>

<pallas_src>
import jax
import jax.numpy as jnp
from jax.experimental import pallas as pl
from jax.experimental.pallas import tpu as pltpu

_LANES = 128                    # lane-dense slab width (one full vreg lane row)
_SUBLANE_ROUND = 32             # covers f32 (8), bf16/f16 (16), int8/fp8 (32) sublane tiling
_XLA_FALLBACK_BYTES = 256 * 1024


def _cdiv(a, b):
    return -(-a // b)


def _round_up(a, m):
    return _cdiv(a, m) * m


def _swish_kernel(x_ref, o_ref):
    # Upcast to f32 in-register (v5e has no bf16 VPU/EUP path; the bandwidth
    # win is in the DMA'd bytes, which stay in the native dtype).
    x = x_ref[...].astype(jnp.float32)
    h = 0.5 * x
    # x * sigmoid(x) == h + h * tanh(h): one EUP tanh, three VALU ops per vreg.
    o_ref[...] = (h * jnp.tanh(h) + h).astype(o_ref.dtype)


def _target_block_bytes():
    """~8 MiB blocks on 128-MiB-VMEM chips (v5e/v6e), ~4 MiB otherwise (v7x/unknown)."""
    try:
        info = pltpu.get_tpu_info()
        vmem = getattr(info, "vmem_capacity_bytes", None)
        if vmem is not None and vmem >= (100 << 20):
            return 8 << 20
    except Exception:
        pass
    return 4 << 20


def _choose_tile_rows(rows, itemsize):
    target = _target_block_bytes()
    tile_rows = max(
        _SUBLANE_ROUND,
        (target // (_LANES * itemsize)) // _SUBLANE_ROUND * _SUBLANE_ROUND,
    )
    if tile_rows >= rows:
        # Single block covering the whole array: full-dim blocks are always legal.
        return rows
    steps = _cdiv(rows, tile_rows)
    if steps > 1 and steps % 2 == 1:
        # Even step count so v7x's two TensorCores split the grid evenly;
        # negligible cost (one extra ~µs-scale step) on single-TC v5e/v6e.
        tile_rows = _round_up(_cdiv(rows, steps + 1), _SUBLANE_ROUND)
    return tile_rows


def swish(x):
    """Elementwise swish/SiLU. Accepts any shape; returns same shape/dtype."""
    orig_shape = x.shape
    n = x.size
    if n == 0:
        return x

    itemsize = jnp.dtype(x.dtype).itemsize
    if n * itemsize < _XLA_FALLBACK_BYTES:
        # Launch + pipeline ramp dominates for tiny activations; XLA fuses this for free.
        return x * jax.nn.sigmoid(x)

    xf = x.reshape(-1)
    rem = n % _LANES
    if rem:
        # Only ragged totals (n % 128 != 0) pay this full-array pad + final slice;
        # swish(0) == 0 so the padding is numerically benign.
        xf = jnp.pad(xf, (0, _LANES - rem))
    rows = xf.shape[0] // _LANES
    x2d = xf.reshape(rows, _LANES)

    tile_rows = _choose_tile_rows(rows, itemsize)
    grid = (pl.cdiv(rows, tile_rows),)  # partial last block handled by masked stores
    block_bytes = tile_rows * _LANES * itemsize

    out2d = pl.pallas_call(
        _swish_kernel,
        out_shape=jax.ShapeDtypeStruct((rows, _LANES), x.dtype),
        grid_spec=pltpu.PrefetchScalarGridSpec(
            num_scalar_prefetch=0,
            grid=grid,
            in_specs=[pl.BlockSpec((tile_rows, _LANES), lambda i: (i, 0))],
            out_specs=pl.BlockSpec((tile_rows, _LANES), lambda i: (i, 0)),
        ),
        compiler_params=pltpu.CompilerParams(
            dimension_semantics=("parallel",),
            # 2 double-buffered arrays (in + out) + headroom; stays well under
            # physical VMEM on every generation (64 MiB on v7x).
            vmem_limit_bytes=min(4 * block_bytes + (16 << 20), 100 << 20),
        ),
    )(x2d)

    out = out2d.reshape(-1)
    if rem:
        out = out[:n]
    return out.reshape(orig_shape)


if __name__ == "__main__":
    key = jax.random.PRNGKey(0)
    k1, k2, k3, k4 = jax.random.split(key, 4)

    # Small NCHW activation (module-scale example) — fused-XLA fallback path.
    x_small = jax.random.normal(k1, (2, 4, 16, 16), dtype=jnp.float32) * 3.0
    y_small = swish(x_small)
    jax.block_until_ready(y_small)
    ref_small = x_small * jax.nn.sigmoid(x_small)
    assert y_small.shape == x_small.shape and y_small.dtype == x_small.dtype
    assert jnp.max(jnp.abs(y_small - ref_small)) < 1e-5

    # Larger f32 activation — exercises the Pallas kernel (lane-dense block path).
    x_f32 = jax.random.normal(k2, (2, 16, 64, 64), dtype=jnp.float32) * 3.0
    y_f32 = swish(x_f32)
    jax.block_until_ready(y_f32)
    ref_f32 = x_f32 * jax.nn.sigmoid(x_f32)
    assert y_f32.shape == x_f32.shape and y_f32.dtype == x_f32.dtype
    assert jnp.max(jnp.abs(y_f32 - ref_f32)) < 5e-3

    # Ragged total size (n % 128 != 0) — exercises the tail-pad path.
    x_rag = jax.random.normal(k3, (129, 517), dtype=jnp.float32) * 3.0
    y_rag = swish(x_rag)
    jax.block_until_ready(y_rag)
    assert jnp.max(jnp.abs(y_rag - x_rag * jax.nn.sigmoid(x_rag))) < 5e-3

    # Native bf16 I/O (kernel upcasts to f32 in-register, stores bf16).
    x_bf16 = (jax.random.normal(k4, (4, 16, 64, 64), dtype=jnp.float32) * 3.0).astype(jnp.bfloat16)
    y_bf16 = swish(x_bf16)
    jax.block_until_ready(y_bf16)
    assert y_bf16.dtype == jnp.bfloat16
    ref_bf16 = x_bf16.astype(jnp.float32) * jax.nn.sigmoid(x_bf16.astype(jnp.float32))
    assert jnp.max(jnp.abs(y_bf16.astype(jnp.float32) - ref_bf16)) < 0.1

    print("KERNEL_OK")
</pallas_src>

<mosaic_0001>
module attributes {stable_mosaic.version = 11 : i64} {
  func.func @_swish_kernel(%arg0: i32, %arg1: memref<1024x128xf32, #tpu.memory_space<vmem>>, %arg2: memref<1024x128xf32, #tpu.memory_space<vmem>>) attributes {dimension_semantics = [#tpu.dimension_semantics<parallel>], iteration_bounds = array<i64: 1>, scalar_prefetch = 0 : i64, scratch_operands = 0 : i64, tpu.core_type = #tpu.core_type<tc>, window_params = [{transform_indices = @transform_0, window_bounds = array<i64: 1024, 128>}, {transform_indices = @transform_1, window_bounds = array<i64: 1024, 128>}]} {
    %c0 = arith.constant 0 : index
    %c0_0 = arith.constant 0 : index
    %0 = vector.load %arg1[%c0, %c0_0] : memref<1024x128xf32, #tpu.memory_space<vmem>>, vector<1024x128xf32>
    %cst = arith.constant 5.000000e-01 : f32
    %1 = vector.broadcast %cst : f32 to vector<1024x128xf32>
    %2 = arith.mulf %1, %0 : vector<1024x128xf32>
    %3 = math.tanh %2 : vector<1024x128xf32>
    %4 = arith.mulf %2, %3 : vector<1024x128xf32>
    %5 = arith.addf %4, %2 : vector<1024x128xf32>
    %c0_1 = arith.constant 0 : index
    %c0_2 = arith.constant 0 : index
    %6 = vector.load %arg2[%c0_1, %c0_2] : memref<1024x128xf32, #tpu.memory_space<vmem>>, vector<1024x128xf32>
    tpu.vector_store %arg2[%c0_1, %c0_2], %5 {strides = array<i32>} : memref<1024x128xf32, #tpu.memory_space<vmem>>, vector<1024x128xf32>,
    return
  }
  func.func @transform_0(%arg0: i32) -> (i32, i32) {
    %c0_i32 = arith.constant 0 : i32
    %c0_i32_0 = arith.constant 0 : i32
    return %arg0, %c0_i32 : i32, i32
  }
  func.func @transform_1(%arg0: i32) -> (i32, i32) {
    %c0_i32 = arith.constant 0 : i32
    %c0_i32_0 = arith.constant 0 : i32
    return %arg0, %c0_i32 : i32, i32
  }
}

</mosaic_0001>

<bundles_post_ra>
// kernel: tpu_custom_call.1
= control target key start
LH: loop header
LB: loop body
LE: loop exit
PB: predicated region body
PF: predicated region fallthrough
CT: control target
= control target key end

     0   :  { %6 = vsyncpa [#allocation3], 0  ;;  %s1790_s0 = inlined_call_operand.hbm [shape: f32[1024,128], index: 0, kind: input, shape index: {}]   ;;  %s1791_s1 = inlined_call_operand.hbm [shape: f32[1024,128], index: 1, kind: output, shape index: {}]  }
   0x1   :  { %7 = vsyncpa [#allocation4], 0  ;;  %s1116_s6 = smov [#allocation2]   ;;  %s1068_s10 = scalar_lea.hbm %s1790_s0, 16384 }
   0x2   :  { %s13_s7 = sshll.u32 %s1116_s6, 4  ;;  %p1069_p0 = scmp.ne.s32.totalorder %s1790_s0, %s1068_s10  ;;  %s14_s7 = int_to_ptr.vmem [resolvable:$true] %s13_s7 }
   0x3   :  { %p1072_p1 = scmp.lt.u32.totalorder %s1068_s10, %s1790_s0 }
   0x5   :  { %p1074_p2 = pnand %p1072_p1, %p1069_p0 }
   0x7   :  { %1077 = shalt.err (!%p1074_p2)
}
   0x8   :  { %s1078_s15 = scalar_lea.vmem %s14_s7, 16384  ;;  %p1083_p4 = scmp.lt.s32.totalorder %s14_s7, %s14_s7 }
   0x9   :  { %p1079_p3 = scmp.ne.s32.totalorder %s14_s7, %s1078_s15  ;;  %p1084_p5 = scmp.lt.s32.totalorder %s1078_s15, %s1078_s15 }
   0xb   :  { %p1085_p6 = por %p1084_p5, %p1083_p4 }
   0xd   :  { %p1086_p7 = pnand %p1085_p6, %p1079_p3 }
   0xf   :  { %1089 = shalt.err (!%p1086_p7)
}
  0x10   :  { %s1117_s16 = smov 128   ;;  %s1118_s17 = smov 8  }
  0x11   :  { %19 = dma.hbm_to_vmem [thread:$0]  %s1790_s0, 16384, %s14_s7, [#allocation3], %s1117_s16, %s1117_s16, %s1118_s17  }
  0x12   :  { %1112 = dma.done.wait [#allocation3], 16384  }
  0x13   :  { %1113 = vsyncadd [#allocation3], 4294950912  ;;  %v23_v0 = vld [vmem:[#allocation2] sm:$0xff]  ;;  %v24_v1 = vld [vmem:[#allocation2 + $0x8] sm:$0xff]  ;;  %s1119_s0 = smov [#allocation5]  }
  0x14   :  { %v25_v2 = vld [vmem:[#allocation2 + $0x10] sm:$0xff]  ;;  %v151_v3 = vmul.f32 0.5, %v23_v0  ;;  %v152_v4 = vmul.f32 0.5, %v24_v1  ;;  %v26_v6 = vld [vmem:[#allocation2 + $0x18] sm:$0xff]  ;;  %v27_v7 = vld [vmem:[#allocation2 + $0x20] sm:$0xff]  ;;  %s796_s20 = sshll.u32 %s1119_s0, 4  ;;  %s797_s20 = int_to_ptr.vmem [resolvable:$true] %s796_s20 }
  0x15   :  { %v1145_v5 = vmul.f32 0.5, %v25_v2  ;;  %v28_v8 = vld [vmem:[#allocation2 + $0x28] sm:$0xff]  ;;  %v1147_v9 = vmul.f32 0.5, %v26_v6  ;;  %v29_v10 = vld [vmem:[#allocation2 + $0x30] sm:$0xff]  ;;  %v1149_v11 = vmul.f32 0.5, %v27_v7  ;;  %v30_v12 = vld [vmem:[#allocation2 + $0x38] sm:$0xff]  ;;  %p1095_p9 = scmp.lt.s32.totalorder %s797_s20, %s797_s20 }
  0x16   :  { %812 = vtanh.f32 %v151_v3  ;;  %v1151_v13 = vmul.f32 0.5, %v28_v8  ;;  %v31_v14 = vld [vmem:[#allocation2 + $0x40] sm:$0xff]  ;;  %v1154_v15 = vmul.f32 0.5, %v29_v10  ;;  %v32_v16 = vld [vmem:[#allocation2 + $0x48] sm:$0xff]  ;;  %v1157_v17 = vmul.f32 0.5, %v30_v12  ;;  %v33_v18 = vld [vmem:[#allocation2 + $0x50] sm:$0xff] }
  0x17   :  { %814 = vtanh.f32 %v152_v4  ;;  %v1160_v19 = vmul.f32 0.5, %v31_v14  ;;  %v34_v20 = vld [vmem:[#allocation2 + $0x58] sm:$0xff]  ;;  %v1163_v21 = vmul.f32 0.5, %v32_v16  ;;  %v35_v22 = vld [vmem:[#allocation2 + $0x60] sm:$0xff]  ;;  %v1166_v23 = vmul.f32 0.5, %v33_v18  ;;  %v36_v24 = vld [vmem:[#allocation2 + $0x68] sm:$0xff] }
  0x18   :  { %816 = vtanh.f32 %v1145_v5  ;;  %v1169_v25 = vmul.f32 0.5, %v34_v20  ;;  %v37_v26 = vld [vmem:[#allocation2 + $0x70] sm:$0xff]  ;;  %v1172_v27 = vmul.f32 0.5, %v35_v22  ;;  %v38_v28 = vld [vmem:[#allocation2 + $0x78] sm:$0xff]  ;;  %v1175_v29 = vmul.f32 0.5, %v36_v24  ;;  %v39_v30 = vld [vmem:[#allocation2 + $0x80] sm:$0xff] }
  0x19   :  { %818 = vtanh.f32 %v1147_v9  ;;  %v1178_v32 = vmul.f32 0.5, %v37_v26  ;;  %v40_v33 = vld [vmem:[#allocation2 + $0x88] sm:$0xff]  ;;  %v1181_v36 = vmul.f32 0.5, %v38_v28  ;;  %v41_v37 = vld [vmem:[#allocation2 + $0x90] sm:$0xff]  ;;  %v1184_v40 = vmul.f32 0.5, %v39_v30  ;;  %v42_v41 = vld [vmem:[#allocation2 + $0x98] sm:$0xff] }
  0x1a   :  { %820 = vtanh.f32 %v1149_v11  ;;  %v1188_v45 = vmul.f32 0.5, %v40_v33  ;;  %v43_v46 = vld [vmem:[#allocation2 + $0xa0] sm:$0xff]  ;;  %v1192_v50 = vmul.f32 0.5, %v41_v37  ;;  %v44_v51 = vld [vmem:[#allocation2 + $0xa8] sm:$0xff]  ;;  %v1197_v55 = vmul.f32 0.5, %v42_v41  ;;  %v45_v56 = vld [vmem:[#allocation2 + $0xb0] sm:$0xff] }
  0x1b   :  { %822 = vtanh.f32 %v1151_v13  ;;  %v1202_v60 = vmul.f32 0.5, %v43_v46  ;;  %v46_v61 = vld [vmem:[#allocation2 + $0xb8] sm:$0xff]  ;;  %v1207_v1 = vmul.f32 0.5, %v44_v51  ;;  %v47_v2 = vld [vmem:[#allocation2 + $0xc0] sm:$0xff]  ;;  %v1212_v6 = vmul.f32 0.5, %v45_v56  ;;  %v48_v7 = vld [vmem:[#allocation2 + $0xc8] sm:$0xff] }
  0x1c   :  { %824 = vtanh.f32 %v1154_v15  ;;  %v49_v12 = vld [vmem:[#allocation2 + $0xd0] sm:$0xff]  ;;  %v1222_v18 = vmul.f32 0.5, %v47_v2  ;;  %v50_v20 = vld [vmem:[#allocation2 + $0xd8] sm:$0xff]  ;;  %v1227_v26 = vmul.f32 0.5, %v48_v7  ;;  %v51_v28 = vld [vmem:[#allocation2 + $0xe0] sm:$0xff]  ;;  %s1090_s21 = scalar_lea.vmem %s797_s20, 16384 }
  0x1d   :  { %826 = vtanh.f32 %v1157_v17  ;;  %v1232_v33 = vmul.f32 0.5, %v49_v12  ;;  %p1091_p8 = scmp.ne.s32.totalorder %s797_s20, %s1090_s21  ;;  %p1096_p10 = scmp.lt.s32.totalorder %s1090_s21, %s1090_s21 }
  0x1e   :  { %828 = vtanh.f32 %v1160_v19 }
  0x1f   :  { %830 = vtanh.f32 %v1163_v21  ;;  %p1097_p11 = por %p1096_p10, %p1095_p9 }
  0x20   :  { %v813_v31 = vpop.eup %812  ;;  %832 = vtanh.f32 %v1166_v23 }
  0x21   :  { %v815_v34 = vpop.eup %814  ;;  %v407_v35 = vmul.f32 %v813_v31, %v151_v3  ;;  %834 = vtanh.f32 %v1169_v25  ;;  %p1098_p12 = pnand %p1097_p11, %p1091_p8 }
  0x22   :  { %v817_v38 = vpop.eup %816  ;;  %v408_v39 = vmul.f32 %v815_v34, %v152_v4  ;;  %836 = vtanh.f32 %v1172_v27  ;;  %v52_v34 = vld [vmem:[#allocation2 + $0xe8] sm:$0xff] }
  0x23   :  { %v819_v42 = vpop.eup %818  ;;  %v535_v43 = vadd.f32 %v407_v35, %v151_v3  ;;  %v409_v44 = vmul.f32 %v817_v38, %v1145_v5  ;;  %838 = vtanh.f32 %v1175_v29  ;;  %v1237_v38 = vmul.f32 0.5, %v50_v20 }
  0x24   :  { %v821_v47 = vpop.eup %820  ;;  %v536_v48 = vadd.f32 %v408_v39, %v152_v4  ;;  %v410_v49 = vmul.f32 %v819_v42, %v1147_v9  ;;  %840 = vtanh.f32 %v1178_v32  ;;  %v53_v39 = vld [vmem:[#allocation2 + $0xf0] sm:$0xff] }
  0x25   :  { %v823_v52 = vpop.eup %822  ;;  %663 = vst [vmem:[#allocation5] sm:$0xff] %v535_v43  ;;  %v537_v53 = vadd.f32 %v409_v44, %v1145_v5  ;;  %v411_v54 = vmul.f32 %v821_v47, %v1149_v11  ;;  %842 = vtanh.f32 %v1181_v36  ;;  %v1242_v43 = vmul.f32 0.5, %v51_v28  ;;  %v54_v44 = vld [vmem:[#allocation2 + $0xf8] sm:$0xff] }
  0x26   :  { %v825_v57 = vpop.eup %824  ;;  %664 = vst [vmem:[#allocation5 + $0x8] sm:$0xff] %v536_v48  ;;  %v538_v58 = vadd.f32 %v410_v49, %v1147_v9  ;;  %v412_v59 = vmul.f32 %v823_v52, %v1151_v13  ;;  %844 = vtanh.f32 %v1184_v40  ;;  %v1247_v48 = vmul.f32 0.5, %v52_v34  ;;  %v55_v49 = vld [vmem:[#allocation2 + $0x100] sm:$0xff] }
  0x27   :  { %v827_v62 = vpop.eup %826  ;;  %665 = vst [vmem:[#allocation5 + $0x10] sm:$0xff] %v537_v53  ;;  %v539_v63 = vadd.f32 %v411_v54, %v1149_v11  ;;  %v413_v0 = vmul.f32 %v825_v57, %v1154_v15  ;;  %846 = vtanh.f32 %v1188_v45  ;;  %v1217_v11 = vmul.f32 0.5, %v46_v61  ;;  %v56_v54 = vld [vmem:[#allocation2 + $0x108] sm:$0xff] }
  0x28   :  { %v829_v3 = vpop.eup %828  ;;  %666 = vst [vmem:[#allocation5 + $0x18] sm:$0xff] %v538_v58  ;;  %v540_v4 = vadd.f32 %v412_v59, %v1151_v13  ;;  %v414_v5 = vmul.f32 %v827_v62, %v1157_v17  ;;  %848 = vtanh.f32 %v1192_v50  ;;  %v1252_v53 = vmul.f32 0.5, %v53_v39  ;;  %v57_v59 = vld [vmem:[#allocation2 + $0x110] sm:$0xff] }
  0x29   :  { %v831_v8 = vpop.eup %830  ;;  %667 = vst [vmem:[#allocation5 + $0x20] sm:$0xff] %v539_v63  ;;  %v541_v9 = vadd.f32 %v413_v0, %v1154_v15  ;;  %v415_v10 = vmul.f32 %v829_v3, %v1160_v19  ;;  %850 = vtanh.f32 %v1197_v55  ;;  %v1257_v58 = vmul.f32 0.5, %v54_v44  ;;  %v58_v0 = vld [vmem:[#allocation2 + $0x118] sm:$0xff] }
  0x2a   :  { %v833_v14 = vpop.eup %832  ;;  %668 = vst [vmem:[#allocation5 + $0x28] sm:$0xff] %v540_v4  ;;  %v542_v13 = vadd.f32 %v414_v5, %v1157_v17  ;;  %v416_v16 = vmul.f32 %v831_v8, %v1163_v21  ;;  %852 = vtanh.f32 %v1202_v60  ;;  %v1262_v63 = vmul.f32 0.5, %v55_v49  ;;  %v59_v5 = vld [vmem:[#allocation2 + $0x120] sm:$0xff] }
  0x2b   :  { %v835_v22 = vpop.eup %834  ;;  %669 = vst [vmem:[#allocation5 + $0x30] sm:$0xff] %v541_v9  ;;  %v543_v15 = vadd.f32 %v415_v10, %v1160_v19  ;;  %v417_v24 = vmul.f32 %v833_v14, %v1166_v23  ;;  %854 = vtanh.f32 %v1207_v1  ;;  %v1267_v4 = vmul.f32 0.5, %v56_v54  ;;  %v60_v10 = vld [vmem:[#allocation2 + $0x128] sm:$0xff] }
  0x2c   :  { %v837_v30 = vpop.eup %836  ;;  %670 = vst [vmem:[#allocation5 + $0x38] sm:$0xff] %v542_v13  ;;  %v544_v17 = vadd.f32 %v416_v16, %v1163_v21  ;;  %v418_v31 = vmul.f32 %v835_v22, %v1169_v25  ;;  %856 = vtanh.f32 %v1212_v6  ;;  %v1272_v9 = vmul.f32 0.5, %v57_v59  ;;  %v61_v16 = vld [vmem:[#allocation2 + $0x130] sm:$0xff] }
  0x2d   :  { %v839_v35 = vpop.eup %838  ;;  %671 = vst [vmem:[#allocation5 + $0x40] sm:$0xff] %v543_v15  ;;  %v545_v19 = vadd.f32 %v417_v24, %v1166_v23  ;;  %v419_v37 = vmul.f32 %v837_v30, %v1172_v27  ;;  %858 = vtanh.f32 %v1217_v11  ;;  %v1277_v13 = vmul.f32 0.5, %v58_v0  ;;  %v62_v24 = vld [vmem:[#allocation2 + $0x138] sm:$0xff] }
  0x2e   :  { %v841_v41 = vpop.eup %840  ;;  %672 = vst [vmem:[#allocation5 + $0x48] sm:$0xff] %v544_v17  ;;  %v546_v21 = vadd.f32 %v418_v31, %v1169_v25  ;;  %v420_v42 = vmul.f32 %v839_v35, %v1175_v29  ;;  %860 = vtanh.f32 %v1222_v18  ;;  %v1282_v15 = vmul.f32 0.5, %v59_v5  ;;  %v63_v31 = vld [vmem:[#allocation2 + $0x140] sm:$0xff] }
  0x2f   :  { %v843_v46 = vpop.eup %842  ;;  %673 = vst [vmem:[#allocation5 + $0x50] sm:$0xff] %v545_v19  ;;  %v547_v23 = vadd.f32 %v419_v37, %v1172_v27  ;;  %v421_v47 = vmul.f32 %v841_v41, %v1178_v32  ;;  %862 = vtanh.f32 %v1227_v26  ;;  %v1287_v17 = vmul.f32 0.5, %v60_v10  ;;  %v64_v37 = vld [vmem:[#allocation2 + $0x148] sm:$0xff] }
  0x30   :  { %v845_v51 = vpop.eup %844  ;;  %674 = vst [vmem:[#allocation5 + $0x58] sm:$0xff] %v546_v21  ;;  %v548_v25 = vadd.f32 %v420_v42, %v1175_v29  ;;  %v422_v52 = vmul.f32 %v843_v46, %v1181_v36  ;;  %864 = vtanh.f32 %v1232_v33  ;;  %v1292_v19 = vmul.f32 0.5, %v61_v16  ;;  %v65_v42 = vld [vmem:[#allocation2 + $0x150] sm:$0xff] }
  0x31   :  { %v847_v56 = vpop.eup %846  ;;  %675 = vst [vmem:[#allocation5 + $0x60] sm:$0xff] %v547_v23  ;;  %v549_v27 = vadd.f32 %v421_v47, %v1178_v32  ;;  %v423_v57 = vmul.f32 %v845_v51, %v1184_v40  ;;  %866 = vtanh.f32 %v1237_v38  ;;  %v1297_v21 = vmul.f32 0.5, %v62_v24  ;;  %v66_v47 = vld [vmem:[#allocation2 + $0x158] sm:$0xff] }
  0x32   :  { %v849_v61 = vpop.eup %848  ;;  %676 = vst [vmem:[#allocation5 + $0x68] sm:$0xff] %v548_v25  ;;  %v550_v29 = vadd.f32 %v422_v52, %v1181_v36  ;;  %v424_v62 = vmul.f32 %v847_v56, %v1188_v45  ;;  %868 = vtanh.f32 %v1242_v43  ;;  %v1302_v23 = vmul.f32 0.5, %v63_v31  ;;  %v67_v52 = vld [vmem:[#allocation2 + $0x160] sm:$0xff] }
  0x33   :  { %v851_v2 = vpop.eup %850  ;;  %677 = vst [vmem:[#allocation5 + $0x70] sm:$0xff] %v549_v27  ;;  %v551_v32 = vadd.f32 %v423_v57, %v1184_v40  ;;  %v425_v3 = vmul.f32 %v849_v61, %v1192_v50  ;;  %870 = vtanh.f32 %v1247_v48  ;;  %v1307_v25 = vmul.f32 0.5, %v64_v37  ;;  %v68_v57 = vld [vmem:[#allocation2 + $0x168] sm:$0xff] }
  0x34   :  { %v853_v7 = vpop.eup %852  ;;  %678 = vst [vmem:[#allocation5 + $0x78] sm:$0xff] %v550_v29  ;;  %v552_v36 = vadd.f32 %v424_v62, %v1188_v45  ;;  %v426_v8 = vmul.f32 %v851_v2, %v1197_v55  ;;  %872 = vtanh.f32 %v1252_v53  ;;  %v1312_v27 = vmul.f32 0.5, %v65_v42  ;;  %v69_v62 = vld [vmem:[#allocation2 + $0x170] sm:$0xff] }
  0x35   :  { %v855_v12 = vpop.eup %854  ;;  %679 = vst [vmem:[#allocation5 + $0x80] sm:$0xff] %v551_v32  ;;  %v553_v40 = vadd.f32 %v425_v3, %v1192_v50  ;;  %v427_v14 = vmul.f32 %v853_v7, %v1202_v60  ;;  %874 = vtanh.f32 %v1257_v58  ;;  %v1317_v29 = vmul.f32 0.5, %v66_v47  ;;  %v70_v3 = vld [vmem:[#allocation2 + $0x178] sm:$0xff] }
  0x36   :  { %v857_v20 = vpop.eup %856  ;;  %680 = vst [vmem:[#allocation5 + $0x88] sm:$0xff] %v552_v36  ;;  %v554_v45 = vadd.f32 %v426_v8, %v1197_v55  ;;  %v428_v22 = vmul.f32 %v855_v12, %v1207_v1  ;;  %876 = vtanh.f32 %v1262_v63  ;;  %v1322_v32 = vmul.f32 0.5, %v67_v52  ;;  %v71_v8 = vld [vmem:[#allocation2 + $0x180] sm:$0xff] }
  0x37   :  { %v859_v28 = vpop.eup %858  ;;  %681 = vst [vmem:[#allocation5 + $0x90] sm:$0xff] %v553_v40  ;;  %v555_v50 = vadd.f32 %v427_v14, %v1202_v60  ;;  %v429_v30 = vmul.f32 %v857_v20, %v1212_v6  ;;  %878 = vtanh.f32 %v1267_v4  ;;  %v1327_v36 = vmul.f32 0.5, %v68_v57  ;;  %v72_v14 = vld [vmem:[#allocation2 + $0x188] sm:$0xff] }
  0x38   :  { %v861_v34 = vpop.eup %860  ;;  %682 = vst [vmem:[#allocation5 + $0x98] sm:$0xff] %v554_v45  ;;  %v556_v55 = vadd.f32 %v428_v22, %v1207_v1  ;;  %v430_v35 = vmul.f32 %v859_v28, %v1217_v11  ;;  %880 = vtanh.f32 %v1272_v9  ;;  %v1332_v40 = vmul.f32 0.5, %v69_v62  ;;  %v73_v22 = vld [vmem:[#allocation2 + $0x190] sm:$0xff] }
  0x39   :  { %v863_v39 = vpop.eup %862  ;;  %683 = vst [vmem:[#allocation5 + $0xa0] sm:$0xff] %v555_v50  ;;  %v557_v60 = vadd.f32 %v429_v30, %v1212_v6  ;;  %v431_v41 = vmul.f32 %v861_v34, %v1222_v18  ;;  %882 = vtanh.f32 %v1277_v13  ;;  %v1337_v45 = vmul.f32 0.5, %v70_v3  ;;  %v74_v30 = vld [vmem:[#allocation2 + $0x198] sm:$0xff] }
  0x3a   :  { %v865_v44 = vpop.eup %864  ;;  %684 = vst [vmem:[#allocation5 + $0xa8] sm:$0xff] %v556_v55  ;;  %v558_v1 = vadd.f32 %v430_v35, %v1217_v11  ;;  %v432_v46 = vmul.f32 %v863_v39, %v1227_v26  ;;  %884 = vtanh.f32 %v1282_v15  ;;  %v1342_v50 = vmul.f32 0.5, %v71_v8  ;;  %v75_v35 = vld [vmem:[#allocation2 + $0x1a0] sm:$0xff] }
  0x3b   :  { %v867_v49 = vpop.eup %866  ;;  %685 = vst [vmem:[#allocation5 + $0xb0] sm:$0xff] %v557_v60  ;;  %v559_v6 = vadd.f32 %v431_v41, %v1222_v18  ;;  %v433_v51 = vmul.f32 %v865_v44, %v1232_v33  ;;  %886 = vtanh.f32 %v1287_v17  ;;  %v1347_v55 = vmul.f32 0.5, %v72_v14  ;;  %v76_v41 = vld [vmem:[#allocation2 + $0x1a8] sm:$0xff] }
  0x3c   :  { %v869_v54 = vpop.eup %868  ;;  %686 = vst [vmem:[#allocation5 + $0xb8] sm:$0xff] %v558_v1  ;;  %v560_v11 = vadd.f32 %v432_v46, %v1227_v26  ;;  %v434_v56 = vmul.f32 %v867_v49, %v1237_v38  ;;  %888 = vtanh.f32 %v1292_v19  ;;  %v1352_v60 = vmul.f32 0.5, %v73_v22  ;;  %v77_v46 = vld [vmem:[#allocation2 + $0x1b0] sm:$0xff] }
  0x3d   :  { %v871_v59 = vpop.eup %870  ;;  %687 = vst [vmem:[#allocation5 + $0xc0] sm:$0xff] %v559_v6  ;;  %v561_v18 = vadd.f32 %v433_v51, %v1232_v33  ;;  %v435_v61 = vmul.f32 %v869_v54, %v1242_v43  ;;  %890 = vtanh.f32 %v1297_v21  ;;  %v1357_v1 = vmul.f32 0.5, %v74_v30  ;;  %v78_v51 = vld [vmem:[#allocation2 + $0x1b8] sm:$0xff] }
  0x3e   :  { %v873_v0 = vpop.eup %872  ;;  %688 = vst [vmem:[#allocation5 + $0xc8] sm:$0xff] %v560_v11  ;;  %v562_v26 = vadd.f32 %v434_v56, %v1237_v38  ;;  %v436_v2 = vmul.f32 %v871_v59, %v1247_v48  ;;  %892 = vtanh.f32 %v1302_v23  ;;  %v1362_v6 = vmul.f32 0.5, %v75_v35  ;;  %v79_v56 = vld [vmem:[#allocation2 + $0x1c0] sm:$0xff] }
  0x3f   :  { %v875_v5 = vpop.eup %874  ;;  %689 = vst [vmem:[#allocation5 + $0xd0] sm:$0xff] %v561_v18  ;;  %v563_v33 = vadd.f32 %v435_v61, %v1242_v43  ;;  %v437_v7 = vmul.f32 %v873_v0, %v1252_v53  ;;  %894 = vtanh.f32 %v1307_v25  ;;  %v1367_v11 = vmul.f32 0.5, %v76_v41  ;;  %v80_v61 = vld [vmem:[#allocation2 + $0x1c8] sm:$0xff] }
  0x40   :  { %v877_v10 = vpop.eup %876  ;;  %690 = vst [vmem:[#allocation5 + $0xd8] sm:$0xff] %v562_v26  ;;  %v564_v38 = vadd.f32 %v436_v2, %v1247_v48  ;;  %v438_v12 = vmul.f32 %v875_v5, %v1257_v58  ;;  %896 = vtanh.f32 %v1312_v27  ;;  %v1372_v18 = vmul.f32 0.5, %v77_v46  ;;  %v81_v2 = vld [vmem:[#allocation2 + $0x1d0] sm:$0xff] }
  0x41   :  { %v879_v16 = vpop.eup %878  ;;  %691 = vst [vmem:[#allocation5 + $0xe0] sm:$0xff] %v563_v33  ;;  %v565_v43 = vadd.f32 %v437_v7, %v1252_v53  ;;  %v439_v20 = vmul.f32 %v877_v10, %v1262_v63  ;;  %898 = vtanh.f32 %v1317_v29  ;;  %v1377_v26 = vmul.f32 0.5, %v78_v51  ;;  %v82_v7 = vld [vmem:[#allocation2 + $0x1d8] sm:$0xff] }
  0x42   :  { %v881_v24 = vpop.eup %880  ;;  %692 = vst [vmem:[#allocation5 + $0xe8] sm:$0xff] %v564_v38  ;;  %v566_v48 = vadd.f32 %v438_v12, %v1257_v58  ;;  %v440_v28 = vmul.f32 %v879_v16, %v1267_v4  ;;  %900 = vtanh.f32 %v1322_v32  ;;  %v1382_v33 = vmul.f32 0.5, %v79_v56  ;;  %v83_v12 = vld [vmem:[#allocation2 + $0x1e0] sm:$0xff] }
  0x43   :  { %v883_v31 = vpop.eup %882  ;;  %693 = vst [vmem:[#allocation5 + $0xf0] sm:$0xff] %v565_v43  ;;  %v567_v53 = vadd.f32 %v439_v20, %v1262_v63  ;;  %v441_v34 = vmul.f32 %v881_v24, %v1272_v9  ;;  %902 = vtanh.f32 %v1327_v36  ;;  %v1387_v38 = vmul.f32 0.5, %v80_v61  ;;  %v84_v20 = vld [vmem:[#allocation2 + $0x1e8] sm:$0xff] }
  0x44   :  { %v885_v37 = vpop.eup %884  ;;  %694 = vst [vmem:[#allocation5 + $0xf8] sm:$0xff] %v566_v48  ;;  %v568_v58 = vadd.f32 %v440_v28, %v1267_v4  ;;  %v442_v39 = vmul.f32 %v883_v31, %v1277_v13  ;;  %904 = vtanh.f32 %v1332_v40  ;;  %v1392_v43 = vmul.f32 0.5, %v81_v2  ;;  %v85_v28 = vld [vmem:[#allocation2 + $0x1f0] sm:$0xff] }
  0x45   :  { %v887_v42 = vpop.eup %886  ;;  %695 = vst [vmem:[#allocation5 + $0x100] sm:$0xff] %v567_v53  ;;  %v569_v63 = vadd.f32 %v441_v34, %v1272_v9  ;;  %v443_v44 = vmul.f32 %v885_v37, %v1282_v15  ;;  %906 = vtanh.f32 %v1337_v45  ;;  %v1397_v48 = vmul.f32 0.5, %v82_v7  ;;  %v86_v34 = vld [vmem:[#allocation2 + $0x1f8] sm:$0xff] }
  0x46   :  { %v889_v47 = vpop.eup %888  ;;  %696 = vst [vmem:[#allocation5 + $0x108] sm:$0xff] %v568_v58  ;;  %v570_v4 = vadd.f32 %v442_v39, %v1277_v13  ;;  %v444_v49 = vmul.f32 %v887_v42, %v1287_v17  ;;  %908 = vtanh.f32 %v1342_v50  ;;  %v1402_v53 = vmul.f32 0.5, %v83_v12  ;;  %v87_v39 = vld [vmem:[#allocation2 + $0x200] sm:$0xff] }
  0x47   :  { %v891_v52 = vpop.eup %890  ;;  %697 = vst [vmem:[#allocation5 + $0x110] sm:$0xff] %v569_v63  ;;  %v571_v9 = vadd.f32 %v443_v44, %v1282_v15  ;;  %v445_v54 = vmul.f32 %v889_v47, %v1292_v19  ;;  %910 = vtanh.f32 %v1347_v55  ;;  %v1407_v58 = vmul.f32 0.5, %v84_v20  ;;  %v88_v44 = vld [vmem:[#allocation2 + $0x208] sm:$0xff] }
  0x48   :  { %v893_v57 = vpop.eup %892  ;;  %698 = vst [vmem:[#allocation5 + $0x118] sm:$0xff] %v570_v4  ;;  %v572_v13 = vadd.f32 %v444_v49, %v1287_v17  ;;  %v446_v59 = vmul.f32 %v891_v52, %v1297_v21  ;;  %912 = vtanh.f32 %v1352_v60  ;;  %v1412_v63 = vmul.f32 0.5, %v85_v28  ;;  %v89_v49 = vld [vmem:[#allocation2 + $0x210] sm:$0xff] }
  0x49   :  { %v895_v62 = vpop.eup %894  ;;  %699 = vst [vmem:[#allocation5 + $0x120] sm:$0xff] %v571_v9  ;;  %v573_v15 = vadd.f32 %v445_v54, %v1292_v19  ;;  %v447_v0 = vmul.f32 %v893_v57, %v1302_v23  ;;  %914 = vtanh.f32 %v1357_v1  ;;  %v1417_v4 = vmul.f32 0.5, %v86_v34  ;;  %v90_v54 = vld [vmem:[#allocation2 + $0x218] sm:$0xff] }
  0x4a   :  { %v897_v3 = vpop.eup %896  ;;  %700 = vst [vmem:[#allocation5 + $0x128] sm:$0xff] %v572_v13  ;;  %v574_v17 = vadd.f32 %v446_v59, %v1297_v21  ;;  %v448_v5 = vmul.f32 %v895_v62, %v1307_v25  ;;  %916 = vtanh.f32 %v1362_v6  ;;  %v1422_v9 = vmul.f32 0.5, %v87_v39  ;;  %v91_v59 = vld [vmem:[#allocation2 + $0x220] sm:$0xff] }
  0x4b   :  { %v899_v8 = vpop.eup %898  ;;  %701 = vst [vmem:[#allocation5 + $0x130] sm:$0xff] %v573_v15  ;;  %v575_v19 = vadd.f32 %v447_v0, %v1302_v23  ;;  %v449_v10 = vmul.f32 %v897_v3, %v1312_v27  ;;  %918 = vtanh.f32 %v1367_v11  ;;  %v1427_v13 = vmul.f32 0.5, %v88_v44  ;;  %v92_v0 = vld [vmem:[#allocation2 + $0x228] sm:$0xff] }
  0x4c   :  { %v901_v14 = vpop.eup %900  ;;  %702 = vst [vmem:[#allocation5 + $0x138] sm:$0xff] %v574_v17  ;;  %v576_v21 = vadd.f32 %v448_v5, %v1307_v25  ;;  %v450_v16 = vmul.f32 %v899_v8, %v1317_v29  ;;  %920 = vtanh.f32 %v1372_v18  ;;  %v1432_v15 = vmul.f32 0.5, %v89_v49  ;;  %v93_v5 = vld [vmem:[#allocation2 + $0x230] sm:$0xff] }
  0x4d   :  { %v903_v22 = vpop.eup %902  ;;  %703 = vst [vmem:[#allocation5 + $0x140] sm:$0xff] %v575_v19  ;;  %v577_v23 = vadd.f32 %v449_v10, %v1312_v27  ;;  %v451_v24 = vmul.f32 %v901_v14, %v1322_v32  ;;  %922 = vtanh.f32 %v1377_v26  ;;  %v1437_v17 = vmul.f32 0.5, %v90_v54  ;;  %v94_v10 = vld [vmem:[#allocation2 + $0x238] sm:$0xff] }
  0x4e   :  { %v905_v30 = vpop.eup %904  ;;  %704 = vst [vmem:[#allocation5 + $0x148] sm:$0xff] %v576_v21  ;;  %v578_v25 = vadd.f32 %v450_v16, %v1317_v29  ;;  %v452_v31 = vmul.f32 %v903_v22, %v1327_v36  ;;  %924 = vtanh.f32 %v1382_v33  ;;  %v1442_v19 = vmul.f32 0.5, %v91_v59  ;;  %v95_v16 = vld [vmem:[#allocation2 + $0x240] sm:$0xff] }
  0x4f   :  { %v907_v35 = vpop.eup %906  ;;  %705 = vst [vmem:[#allocation5 + $0x150] sm:$0xff] %v577_v23  ;;  %v579_v27 = vadd.f32 %v451_v24, %v1322_v32  ;;  %v453_v37 = vmul.f32 %v905_v30, %v1332_v40  ;;  %926 = vtanh.f32 %v1387_v38  ;;  %v1447_v21 = vmul.f32 0.5, %v92_v0  ;;  %v96_v24 = vld [vmem:[#allocation2 + $0x248] sm:$0xff] }
  0x50   :  { %v909_v41 = vpop.eup %908  ;;  %706 = vst [vmem:[#allocation5 + $0x158] sm:$0xff] %v578_v25  ;;  %v580_v29 = vadd.f32 %v452_v31, %v1327_v36  ;;  %v454_v42 = vmul.f32 %v907_v35, %v1337_v45  ;;  %928 = vtanh.f32 %v1392_v43  ;;  %v1452_v23 = vmul.f32 0.5, %v93_v5  ;;  %v97_v31 = vld [vmem:[#allocation2 + $0x250] sm:$0xff] }
  0x51   :  { %v911_v46 = vpop.eup %910  ;;  %707 = vst [vmem:[#allocation5 + $0x160] sm:$0xff] %v579_v27  ;;  %v581_v32 = vadd.f32 %v453_v37, %v1332_v40  ;;  %v455_v47 = vmul.f32 %v909_v41, %v1342_v50  ;;  %930 = vtanh.f32 %v1397_v48  ;;  %v1457_v25 = vmul.f32 0.5, %v94_v10  ;;  %v98_v37 = vld [vmem:[#allocation2 + $0x258] sm:$0xff] }
  0x52   :  { %v913_v51 = vpop.eup %912  ;;  %708 = vst [vmem:[#allocation5 + $0x168] sm:$0xff] %v580_v29  ;;  %v582_v36 = vadd.f32 %v454_v42, %v1337_v45  ;;  %v456_v52 = vmul.f32 %v911_v46, %v1347_v55  ;;  %932 = vtanh.f32 %v1402_v53  ;;  %v1462_v27 = vmul.f32 0.5, %v95_v16  ;;  %v99_v42 = vld [vmem:[#allocation2 + $0x260] sm:$0xff] }
  0x53   :  { %v915_v56 = vpop.eup %914  ;;  %709 = vst [vmem:[#allocation5 + $0x170] sm:$0xff] %v581_v32  ;;  %v583_v40 = vadd.f32 %v455_v47, %v1342_v50  ;;  %v457_v57 = vmul.f32 %v913_v51, %v1352_v60  ;;  %934 = vtanh.f32 %v1407_v58  ;;  %v1467_v29 = vmul.f32 0.5, %v96_v24  ;;  %v100_v47 = vld [vmem:[#allocation2 + $0x268] sm:$0xff] }
  0x54   :  { %v917_v61 = vpop.eup %916  ;;  %710 = vst [vmem:[#allocation5 + $0x178] sm:$0xff] %v582_v36  ;;  %v584_v45 = vadd.f32 %v456_v52, %v1347_v55  ;;  %v458_v62 = vmul.f32 %v915_v56, %v1357_v1  ;;  %936 = vtanh.f32 %v1412_v63  ;;  %v1472_v32 = vmul.f32 0.5, %v97_v31  ;;  %v101_v52 = vld [vmem:[#allocation2 + $0x270] sm:$0xff] }
  0x55   :  { %v919_v2 = vpop.eup %918  ;;  %711 = vst [vmem:[#allocation5 + $0x180] sm:$0xff] %v583_v40  ;;  %v585_v50 = vadd.f32 %v457_v57, %v1352_v60  ;;  %v459_v3 = vmul.f32 %v917_v61, %v1362_v6  ;;  %938 = vtanh.f32 %v1417_v4  ;;  %v1477_v36 = vmul.f32 0.5, %v98_v37  ;;  %v102_v57 = vld [vmem:[#allocation2 + $0x278] sm:$0xff] }
  0x56   :  { %v921_v7 = vpop.eup %920  ;;  %712 = vst [vmem:[#allocation5 + $0x188] sm:$0xff] %v584_v45  ;;  %v586_v55 = vadd.f32 %v458_v62, %v1357_v1  ;;  %v460_v8 = vmul.f32 %v919_v2, %v1367_v11  ;;  %940 = vtanh.f32 %v1422_v9  ;;  %v1482_v40 = vmul.f32 0.5, %v99_v42  ;;  %v103_v62 = vld [vmem:[#allocation2 + $0x280] sm:$0xff] }
  0x57   :  { %v923_v12 = vpop.eup %922  ;;  %713 = vst [vmem:[#allocation5 + $0x190] sm:$0xff] %v585_v50  ;;  %v587_v60 = vadd.f32 %v459_v3, %v1362_v6  ;;  %v461_v14 = vmul.f32 %v921_v7, %v1372_v18  ;;  %942 = vtanh.f32 %v1427_v13  ;;  %v1487_v45 = vmul.f32 0.5, %v100_v47  ;;  %v104_v3 = vld [vmem:[#allocation2 + $0x288] sm:$0xff] }
  0x58   :  { %v925_v20 = vpop.eup %924  ;;  %714 = vst [vmem:[#allocation5 + $0x198] sm:$0xff] %v586_v55  ;;  %v588_v1 = vadd.f32 %v460_v8, %v1367_v11  ;;  %v462_v22 = vmul.f32 %v923_v12, %v1377_v26  ;;  %944 = vtanh.f32 %v1432_v15  ;;  %v1492_v50 = vmul.f32 0.5, %v101_v52  ;;  %v105_v8 = vld [vmem:[#allocation2 + $0x290] sm:$0xff] }
  0x59   :  { %v927_v28 = vpop.eup %926  ;;  %715 = vst [vmem:[#allocation5 + $0x1a0] sm:$0xff] %v587_v60  ;;  %v589_v6 = vadd.f32 %v461_v14, %v1372_v18  ;;  %v463_v30 = vmul.f32 %v925_v20, %v1382_v33  ;;  %946 = vtanh.f32 %v1437_v17  ;;  %v1497_v55 = vmul.f32 0.5, %v102_v57  ;;  %v106_v14 = vld [vmem:[#allocation2 + $0x298] sm:$0xff] }
  0x5a   :  { %v929_v34 = vpop.eup %928  ;;  %716 = vst [vmem:[#allocation5 + $0x1a8] sm:$0xff] %v588_v1  ;;  %v590_v11 = vadd.f32 %v462_v22, %v1377_v26  ;;  %v464_v35 = vmul.f32 %v927_v28, %v1387_v38  ;;  %948 = vtanh.f32 %v1442_v19  ;;  %v1502_v60 = vmul.f32 0.5, %v103_v62  ;;  %v107_v22 = vld [vmem:[#allocation2 + $0x2a0] sm:$0xff] }
  0x5b   :  { %v931_v39 = vpop.eup %930  ;;  %717 = vst [vmem:[#allocation5 + $0x1b0] sm:$0xff] %v589_v6  ;;  %v591_v18 = vadd.f32 %v463_v30, %v1382_v33  ;;  %v465_v41 = vmul.f32 %v929_v34, %v1392_v43  ;;  %950 = vtanh.f32 %v1447_v21  ;;  %v1507_v1 = vmul.f32 0.5, %v104_v3  ;;  %v108_v30 = vld [vmem:[#allocation2 + $0x2a8] sm:$0xff] }
  0x5c   :  { %v933_v44 = vpop.eup %932  ;;  %718 = vst [vmem:[#allocation5 + $0x1b8] sm:$0xff] %v590_v11  ;;  %v592_v26 = vadd.f32 %v464_v35, %v1387_v38  ;;  %v466_v46 = vmul.f32 %v931_v39, %v1397_v48  ;;  %952 = vtanh.f32 %v1452_v23  ;;  %v1512_v6 = vmul.f32 0.5, %v105_v8  ;;  %v109_v35 = vld [vmem:[#allocation2 + $0x2b0] sm:$0xff] }
  0x5d   :  { %v935_v49 = vpop.eup %934  ;;  %719 = vst [vmem:[#allocation5 + $0x1c0] sm:$0xff] %v591_v18  ;;  %v593_v33 = vadd.f32 %v465_v41, %v1392_v43  ;;  %v467_v51 = vmul.f32 %v933_v44, %v1402_v53  ;;  %954 = vtanh.f32 %v1457_v25  ;;  %v1517_v11 = vmul.f32 0.5, %v106_v14  ;;  %v110_v41 = vld [vmem:[#allocation2 + $0x2b8] sm:$0xff] }
  0x5e   :  { %v937_v54 = vpop.eup %936  ;;  %720 = vst [vmem:[#allocation5 + $0x1c8] sm:$0xff] %v592_v26  ;;  %v594_v38 = vadd.f32 %v466_v46, %v1397_v48  ;;  %v468_v56 = vmul.f32 %v935_v49, %v1407_v58  ;;  %956 = vtanh.f32 %v1462_v27  ;;  %v1522_v18 = vmul.f32 0.5, %v107_v22  ;;  %v111_v46 = vld [vmem:[#allocation2 + $0x2c0] sm:$0xff] }
  0x5f   :  { %v939_v59 = vpop.eup %938  ;;  %721 = vst [vmem:[#allocation5 + $0x1d0] sm:$0xff] %v593_v33  ;;  %v595_v43 = vadd.f32 %v467_v51, %v1402_v53  ;;  %v469_v61 = vmul.f32 %v937_v54, %v1412_v63  ;;  %958 = vtanh.f32 %v1467_v29  ;;  %v1527_v26 = vmul.f32 0.5, %v108_v30  ;;  %v112_v51 = vld [vmem:[#allocation2 + $0x2c8] sm:$0xff] }
  0x60   :  { %v941_v0 = vpop.eup %940  ;;  %722 = vst [vmem:[#allocation5 + $0x1d8] sm:$0xff] %v594_v38  ;;  %v596_v48 = vadd.f32 %v468_v56, %v1407_v58  ;;  %v470_v2 = vmul.f32 %v939_v59, %v1417_v4  ;;  %960 = vtanh.f32 %v1472_v32  ;;  %v1532_v33 = vmul.f32 0.5, %v109_v35  ;;  %v113_v56 = vld [vmem:[#allocation2 + $0x2d0] sm:$0xff] }
  0x61   :  { %v943_v5 = vpop.eup %942  ;;  %723 = vst [vmem:[#allocation5 + $0x1e0] sm:$0xff] %v595_v43  ;;  %v597_v53 = vadd.f32 %v469_v61, %v1412_v63  ;;  %v471_v7 = vmul.f32 %v941_v0, %v1422_v9  ;;  %962 = vtanh.f32 %v1477_v36  ;;  %v1537_v38 = vmul.f32 0.5, %v110_v41  ;;  %v114_v61 = vld [vmem:[#allocation2 + $0x2d8] sm:$0xff] }
  0x62   :  { %v945_v10 = vpop.eup %944  ;;  %724 = vst [vmem:[#allocation5 + $0x1e8] sm:$0xff] %v596_v48  ;;  %v598_v58 = vadd.f32 %v470_v2, %v1417_v4  ;;  %v472_v12 = vmul.f32 %v943_v5, %v1427_v13  ;;  %964 = vtanh.f32 %v1482_v40  ;;  %v1542_v43 = vmul.f32 0.5, %v111_v46  ;;  %v115_v2 = vld [vmem:[#allocation2 + $0x2e0] sm:$0xff] }
  0x63   :  { %v947_v16 = vpop.eup %946  ;;  %725 = vst [vmem:[#allocation5 + $0x1f0] sm:$0xff] %v597_v53  ;;  %v599_v63 = vadd.f32 %v471_v7, %v1422_v9  ;;  %v473_v20 = vmul.f32 %v945_v10, %v1432_v15  ;;  %966 = vtanh.f32 %v1487_v45  ;;  %v1547_v48 = vmul.f32 0.5, %v112_v51  ;;  %v116_v7 = vld [vmem:[#allocation2 + $0x2e8] sm:$0xff] }
  0x64   :  { %v949_v24 = vpop.eup %948  ;;  %726 = vst [vmem:[#allocation5 + $0x1f8] sm:$0xff] %v598_v58  ;;  %v600_v4 = vadd.f32 %v472_v12, %v1427_v13  ;;  %v474_v28 = vmul.f32 %v947_v16, %v1437_v17  ;;  %968 = vtanh.f32 %v1492_v50  ;;  %v1552_v53 = vmul.f32 0.5, %v113_v56  ;;  %v117_v12 = vld [vmem:[#allocation2 + $0x2f0] sm:$0xff] }
  0x65   :  { %v951_v31 = vpop.eup %950  ;;  %727 = vst [vmem:[#allocation5 + $0x200] sm:$0xff] %v599_v63  ;;  %v601_v9 = vadd.f32 %v473_v20, %v1432_v15  ;;  %v475_v34 = vmul.f32 %v949_v24, %v1442_v19  ;;  %970 = vtanh.f32 %v1497_v55  ;;  %v1557_v58 = vmul.f32 0.5, %v114_v61  ;;  %v118_v20 = vld [vmem:[#allocation2 + $0x2f8] sm:$0xff] }
  0x66   :  { %v953_v37 = vpop.eup %952  ;;  %728 = vst [vmem:[#allocation5 + $0x208] sm:$0xff] %v600_v4  ;;  %v602_v13 = vadd.f32 %v474_v28, %v1437_v17  ;;  %v476_v39 = vmul.f32 %v951_v31, %v1447_v21  ;;  %972 = vtanh.f32 %v1502_v60  ;;  %v1562_v63 = vmul.f32 0.5, %v115_v2  ;;  %v119_v28 = vld [vmem:[#allocation2 + $0x300] sm:$0xff] }
  0x67   :  { %v955_v42 = vpop.eup %954  ;;  %729 = vst [vmem:[#allocation5 + $0x210] sm:$0xff] %v601_v9  ;;  %v603_v15 = vadd.f32 %v475_v34, %v1442_v19  ;;  %v477_v44 = vmul.f32 %v953_v37, %v1452_v23  ;;  %974 = vtanh.f32 %v1507_v1  ;;  %v1567_v4 = vmul.f32 0.5, %v116_v7  ;;  %v120_v34 = vld [vmem:[#allocation2 + $0x308] sm:$0xff] }
  0x68   :  { %v957_v47 = vpop.eup %956  ;;  %730 = vst [vmem:[#allocation5 + $0x218] sm:$0xff] %v602_v13  ;;  %v604_v17 = vadd.f32 %v476_v39, %v1447_v21  ;;  %v478_v49 = vmul.f32 %v955_v42, %v1457_v25  ;;  %976 = vtanh.f32 %v1512_v6  ;;  %v1572_v9 = vmul.f32 0.5, %v117_v12  ;;  %v121_v39 = vld [vmem:[#allocation2 + $0x310] sm:$0xff] }
  0x69   :  { %v959_v52 = vpop.eup %958  ;;  %731 = vst [vmem:[#allocation5 + $0x220] sm:$0xff] %v603_v15  ;;  %v605_v19 = vadd.f32 %v477_v44, %v1452_v23  ;;  %v479_v54 = vmul.f32 %v957_v47, %v1462_v27  ;;  %978 = vtanh.f32 %v1517_v11  ;;  %v1577_v13 = vmul.f32 0.5, %v118_v20  ;;  %v122_v44 = vld [vmem:[#allocation2 + $0x318] sm:$0xff] }
  0x6a   :  { %v961_v57 = vpop.eup %960  ;;  %732 = vst [vmem:[#allocation5 + $0x228] sm:$0xff] %v604_v17  ;;  %v606_v21 = vadd.f32 %v478_v49, %v1457_v25  ;;  %v480_v59 = vmul.f32 %v959_v52, %v1467_v29  ;;  %980 = vtanh.f32 %v1522_v18  ;;  %v1582_v15 = vmul.f32 0.5, %v119_v28  ;;  %v123_v49 = vld [vmem:[#allocation2 + $0x320] sm:$0xff] }
  0x6b   :  { %v963_v62 = vpop.eup %962  ;;  %733 = vst [vmem:[#allocation5 + $0x230] sm:$0xff] %v605_v19  ;;  %v607_v23 = vadd.f32 %v479_v54, %v1462_v27  ;;  %v481_v0 = vmul.f32 %v961_v57, %v1472_v32  ;;  %982 = vtanh.f32 %v1527_v26  ;;  %v1587_v17 = vmul.f32 0.5, %v120_v34  ;;  %v124_v54 = vld [vmem:[#allocation2 + $0x328] sm:$0xff] }
  0x6c   :  { %v965_v3 = vpop.eup %964  ;;  %734 = vst [vmem:[#allocation5 + $0x238] sm:$0xff] %v606_v21  ;;  %v608_v25 = vadd.f32 %v480_v59, %v1467_v29  ;;  %v482_v5 = vmul.f32 %v963_v62, %v1477_v36  ;;  %984 = vtanh.f32 %v1532_v33  ;;  %v1592_v19 = vmul.f32 0.5, %v121_v39  ;;  %v125_v59 = vld [vmem:[#allocation2 + $0x330] sm:$0xff] }
  0x6d   :  { %v967_v8 = vpop.eup %966  ;;  %735 = vst [vmem:[#allocation5 + $0x240] sm:$0xff] %v607_v23  ;;  %v609_v27 = vadd.f32 %v481_v0, %v1472_v32  ;;  %v483_v10 = vmul.f32 %v965_v3, %v1482_v40  ;;  %986 = vtanh.f32 %v1537_v38  ;;  %v1597_v21 = vmul.f32 0.5, %v122_v44  ;;  %v126_v0 = vld [vmem:[#allocation2 + $0x338] sm:$0xff] }
  0x6e   :  { %v969_v14 = vpop.eup %968  ;;  %736 = vst [vmem:[#allocation5 + $0x248] sm:$0xff] %v608_v25  ;;  %v610_v29 = vadd.f32 %v482_v5, %v1477_v36  ;;  %v484_v16 = vmul.f32 %v967_v8, %v1487_v45  ;;  %988 = vtanh.f32 %v1542_v43  ;;  %v1602_v23 = vmul.f32 0.5, %v123_v49  ;;  %v127_v5 = vld [vmem:[#allocation2 + $0x340] sm:$0xff] }
  0x6f   :  { %v971_v22 = vpop.eup %970  ;;  %737 = vst [vmem:[#allocation5 + $0x250] sm:$0xff] %v609_v27  ;;  %v611_v32 = vadd.f32 %v483_v10, %v1482_v40  ;;  %v485_v24 = vmul.f32 %v969_v14, %v1492_v50  ;;  %990 = vtanh.f32 %v1547_v48  ;;  %v1607_v25 = vmul.f32 0.5, %v124_v54  ;;  %v128_v10 = vld [vmem:[#allocation2 + $0x348] sm:$0xff] }
  0x70   :  { %v973_v30 = vpop.eup %972  ;;  %738 = vst [vmem:[#allocation5 + $0x258] sm:$0xff] %v610_v29  ;;  %v612_v36 = vadd.f32 %v484_v16, %v1487_v45  ;;  %v486_v31 = vmul.f32 %v971_v22, %v1497_v55  ;;  %992 = vtanh.f32 %v1552_v53  ;;  %v1612_v27 = vmul.f32 0.5, %v125_v59  ;;  %v129_v16 = vld [vmem:[#allocation2 + $0x350] sm:$0xff] }
  0x71   :  { %v975_v35 = vpop.eup %974  ;;  %739 = vst [vmem:[#allocation5 + $0x260] sm:$0xff] %v611_v32  ;;  %v613_v40 = vadd.f32 %v485_v24, %v1492_v50  ;;  %v487_v37 = vmul.f32 %v973_v30, %v1502_v60  ;;  %994 = vtanh.f32 %v1557_v58  ;;  %v1617_v29 = vmul.f32 0.5, %v126_v0  ;;  %v130_v24 = vld [vmem:[#allocation2 + $0x358] sm:$0xff] }
  0x72   :  { %v977_v41 = vpop.eup %976  ;;  %740 = vst [vmem:[#allocation5 + $0x268] sm:$0xff] %v612_v36  ;;  %v614_v45 = vadd.f32 %v486_v31, %v1497_v55  ;;  %v488_v42 = vmul.f32 %v975_v35, %v1507_v1  ;;  %996 = vtanh.f32 %v1562_v63  ;;  %v1622_v32 = vmul.f32 0.5, %v127_v5  ;;  %v131_v31 = vld [vmem:[#allocation2 + $0x360] sm:$0xff] }
  0x73   :  { %v979_v46 = vpop.eup %978  ;;  %741 = vst [vmem:[#allocation5 + $0x270] sm:$0xff] %v613_v40  ;;  %v615_v50 = vadd.f32 %v487_v37, %v1502_v60  ;;  %v489_v47 = vmul.f32 %v977_v41, %v1512_v6  ;;  %998 = vtanh.f32 %v1567_v4  ;;  %v1627_v36 = vmul.f32 0.5, %v128_v10  ;;  %v132_v37 = vld [vmem:[#allocation2 + $0x368] sm:$0xff] }
  0x74   :  { %v981_v51 = vpop.eup %980  ;;  %742 = vst [vmem:[#allocation5 + $0x278] sm:$0xff] %v614_v45  ;;  %v616_v55 = vadd.f32 %v488_v42, %v1507_v1  ;;  %v490_v52 = vmul.f32 %v979_v46, %v1517_v11  ;;  %1000 = vtanh.f32 %v1572_v9  ;;  %v1632_v40 = vmul.f32 0.5, %v129_v16  ;;  %v133_v42 = vld [vmem:[#allocation2 + $0x370] sm:$0xff] }
  0x75   :  { %v983_v56 = vpop.eup %982  ;;  %743 = vst [vmem:[#allocation5 + $0x280] sm:$0xff] %v615_v50  ;;  %v617_v60 = vadd.f32 %v489_v47, %v1512_v6  ;;  %v491_v57 = vmul.f32 %v981_v51, %v1522_v18  ;;  %1002 = vtanh.f32 %v1577_v13  ;;  %v1637_v45 = vmul.f32 0.5, %v130_v24  ;;  %v134_v47 = vld [vmem:[#allocation2 + $0x378] sm:$0xff] }
  0x76   :  { %v985_v61 = vpop.eup %984  ;;  %744 = vst [vmem:[#allocation5 + $0x288] sm:$0xff] %v616_v55  ;;  %v618_v1 = vadd.f32 %v490_v52, %v1517_v11  ;;  %v492_v62 = vmul.f32 %v983_v56, %v1527_v26  ;;  %1004 = vtanh.f32 %v1582_v15  ;;  %v1642_v50 = vmul.f32 0.5, %v131_v31  ;;  %v135_v52 = vld [vmem:[#allocation2 + $0x380] sm:$0xff] }
  0x77   :  { %v987_v2 = vpop.eup %986  ;;  %745 = vst [vmem:[#allocation5 + $0x290] sm:$0xff] %v617_v60  ;;  %v619_v6 = vadd.f32 %v491_v57, %v1522_v18  ;;  %v493_v3 = vmul.f32 %v985_v61, %v1532_v33  ;;  %1006 = vtanh.f32 %v1587_v17  ;;  %v1647_v55 = vmul.f32 0.5, %v132_v37  ;;  %v136_v57 = vld [vmem:[#allocation2 + $0x388] sm:$0xff] }
  0x78   :  { %v989_v7 = vpop.eup %988  ;;  %746 = vst [vmem:[#allocation5 + $0x298] sm:$0xff] %v618_v1  ;;  %v620_v11 = vadd.f32 %v492_v62, %v1527_v26  ;;  %v494_v8 = vmul.f32 %v987_v2, %v1537_v38  ;;  %1008 = vtanh.f32 %v1592_v19  ;;  %v1652_v60 = vmul.f32 0.5, %v133_v42  ;;  %v137_v62 = vld [vmem:[#allocation2 + $0x390] sm:$0xff] }
  0x79   :  { %v991_v12 = vpop.eup %990  ;;  %747 = vst [vmem:[#allocation5 + $0x2a0] sm:$0xff] %v619_v6  ;;  %v621_v18 = vadd.f32 %v493_v3, %v1532_v33  ;;  %v495_v14 = vmul.f32 %v989_v7, %v1542_v43  ;;  %1010 = vtanh.f32 %v1597_v21  ;;  %v1657_v1 = vmul.f32 0.5, %v134_v47  ;;  %v138_v3 = vld [vmem:[#allocation2 + $0x398] sm:$0xff] }
  0x7a   :  { %v993_v20 = vpop.eup %992  ;;  %748 = vst [vmem:[#allocation5 + $0x2a8] sm:$0xff] %v620_v11  ;;  %v622_v26 = vadd.f32 %v494_v8, %v1537_v38  ;;  %v496_v22 = vmul.f32 %v991_v12, %v1547_v48  ;;  %1012 = vtanh.f32 %v1602_v23  ;;  %v1662_v6 = vmul.f32 0.5, %v135_v52  ;;  %v139_v8 = vld [vmem:[#allocation2 + $0x3a0] sm:$0xff] }
  0x7b   :  { %v995_v28 = vpop.eup %994  ;;  %749 = vst [vmem:[#allocation5 + $0x2b0] sm:$0xff] %v621_v18  ;;  %v623_v33 = vadd.f32 %v495_v14, %v1542_v43  ;;  %v497_v30 = vmul.f32 %v993_v20, %v1552_v53  ;;  %1014 = vtanh.f32 %v1607_v25  ;;  %v1667_v11 = vmul.f32 0.5, %v136_v57  ;;  %v140_v14 = vld [vmem:[#allocation2 + $0x3a8] sm:$0xff] }
  0x7c   :  { %v997_v34 = vpop.eup %996  ;;  %750 = vst [vmem:[#allocation5 + $0x2b8] sm:$0xff] %v622_v26  ;;  %v624_v38 = vadd.f32 %v496_v22, %v1547_v48  ;;  %v498_v35 = vmul.f32 %v995_v28, %v1557_v58  ;;  %1016 = vtanh.f32 %v1612_v27  ;;  %v1672_v18 = vmul.f32 0.5, %v137_v62  ;;  %v141_v22 = vld [vmem:[#allocation2 + $0x3b0] sm:$0xff] }
  0x7d   :  { %v999_v39 = vpop.eup %998  ;;  %751 = vst [vmem:[#allocation5 + $0x2c0] sm:$0xff] %v623_v33  ;;  %v625_v43 = vadd.f32 %v497_v30, %v1552_v53  ;;  %v499_v41 = vmul.f32 %v997_v34, %v1562_v63  ;;  %1018 = vtanh.f32 %v1617_v29  ;;  %v1677_v26 = vmul.f32 0.5, %v138_v3  ;;  %v142_v30 = vld [vmem:[#allocation2 + $0x3b8] sm:$0xff] }
  0x7e   :  { %v1001_v44 = vpop.eup %1000  ;;  %752 = vst [vmem:[#allocation5 + $0x2c8] sm:$0xff] %v624_v38  ;;  %v626_v48 = vadd.f32 %v498_v35, %v1557_v58  ;;  %v500_v46 = vmul.f32 %v999_v39, %v1567_v4  ;;  %1020 = vtanh.f32 %v1622_v32  ;;  %v1682_v33 = vmul.f32 0.5, %v139_v8  ;;  %v143_v35 = vld [vmem:[#allocation2 + $0x3c0] sm:$0xff] }
  0x7f   :  { %v1003_v49 = vpop.eup %1002  ;;  %753 = vst [vmem:[#allocation5 + $0x2d0] sm:$0xff] %v625_v43  ;;  %v627_v53 = vadd.f32 %v499_v41, %v1562_v63  ;;  %v501_v51 = vmul.f32 %v1001_v44, %v1572_v9  ;;  %1022 = vtanh.f32 %v1627_v36  ;;  %v1687_v38 = vmul.f32 0.5, %v140_v14  ;;  %v144_v41 = vld [vmem:[#allocation2 + $0x3c8] sm:$0xff] }
  0x80   :  { %v1005_v54 = vpop.eup %1004  ;;  %754 = vst [vmem:[#allocation5 + $0x2d8] sm:$0xff] %v626_v48  ;;  %v628_v58 = vadd.f32 %v500_v46, %v1567_v4  ;;  %v502_v56 = vmul.f32 %v1003_v49, %v1577_v13  ;;  %1024 = vtanh.f32 %v1632_v40  ;;  %v1692_v43 = vmul.f32 0.5, %v141_v22  ;;  %v145_v46 = vld [vmem:[#allocation2 + $0x3d0] sm:$0xff] }
  0x81   :  { %v1007_v59 = vpop.eup %1006  ;;  %755 = vst [vmem:[#allocation5 + $0x2e0] sm:$0xff] %v627_v53  ;;  %v629_v63 = vadd.f32 %v501_v51, %v1572_v9  ;;  %v503_v61 = vmul.f32 %v1005_v54, %v1582_v15  ;;  %1026 = vtanh.f32 %v1637_v45  ;;  %v1697_v48 = vmul.f32 0.5, %v142_v30  ;;  %v146_v51 = vld [vmem:[#allocation2 + $0x3d8] sm:$0xff] }
  0x82   :  { %v1009_v0 = vpop.eup %1008  ;;  %756 = vst [vmem:[#allocation5 + $0x2e8] sm:$0xff] %v628_v58  ;;  %v630_v4 = vadd.f32 %v502_v56, %v1577_v13  ;;  %v504_v2 = vmul.f32 %v1007_v59, %v1587_v17  ;;  %1028 = vtanh.f32 %v1642_v50  ;;  %v1702_v53 = vmul.f32 0.5, %v143_v35  ;;  %v147_v56 = vld [vmem:[#allocation2 + $0x3e0] sm:$0xff] }
  0x83   :  { %v1011_v5 = vpop.eup %1010  ;;  %757 = vst [vmem:[#allocation5 + $0x2f0] sm:$0xff] %v629_v63  ;;  %v631_v9 = vadd.f32 %v503_v61, %v1582_v15  ;;  %v505_v7 = vmul.f32 %v1009_v0, %v1592_v19  ;;  %1030 = vtanh.f32 %v1647_v55  ;;  %v1707_v58 = vmul.f32 0.5, %v144_v41  ;;  %v148_v61 = vld [vmem:[#allocation2 + $0x3e8] sm:$0xff] }
  0x84   :  { %v1013_v10 = vpop.eup %1012  ;;  %758 = vst [vmem:[#allocation5 + $0x2f8] sm:$0xff] %v630_v4  ;;  %v632_v13 = vadd.f32 %v504_v2, %v1587_v17  ;;  %v506_v12 = vmul.f32 %v1011_v5, %v1597_v21  ;;  %1032 = vtanh.f32 %v1652_v60  ;;  %v1712_v63 = vmul.f32 0.5, %v145_v46  ;;  %v149_v2 = vld [vmem:[#allocation2 + $0x3f0] sm:$0xff] }
  0x85   :  { %v1015_v16 = vpop.eup %1014  ;;  %759 = vst [vmem:[#allocation5 + $0x300] sm:$0xff] %v631_v9  ;;  %v633_v15 = vadd.f32 %v505_v7, %v1592_v19  ;;  %v507_v20 = vmul.f32 %v1013_v10, %v1602_v23  ;;  %1034 = vtanh.f32 %v1657_v1  ;;  %v1717_v4 = vmul.f32 0.5, %v146_v51  ;;  %v150_v7 = vld [vmem:[#allocation2 + $0x3f8] sm:$0xff] }
  0x86   :  { %v1017_v24 = vpop.eup %1016  ;;  %760 = vst [vmem:[#allocation5 + $0x308] sm:$0xff] %v632_v13  ;;  %v634_v17 = vadd.f32 %v506_v12, %v1597_v21  ;;  %v508_v28 = vmul.f32 %v1015_v16, %v1607_v25  ;;  %1036 = vtanh.f32 %v1662_v6  ;;  %v1722_v9 = vmul.f32 0.5, %v147_v56 }
  0x87   :  { %v1019_v31 = vpop.eup %1018  ;;  %761 = vst [vmem:[#allocation5 + $0x310] sm:$0xff] %v633_v15  ;;  %v635_v19 = vadd.f32 %v507_v20, %v1602_v23  ;;  %v509_v34 = vmul.f32 %v1017_v24, %v1612_v27  ;;  %1038 = vtanh.f32 %v1667_v11  ;;  %v1727_v13 = vmul.f32 0.5, %v148_v61 }
  0x88   :  { %v1021_v37 = vpop.eup %1020  ;;  %762 = vst [vmem:[#allocation5 + $0x318] sm:$0xff] %v634_v17  ;;  %v636_v21 = vadd.f32 %v508_v28, %v1607_v25  ;;  %v510_v39 = vmul.f32 %v1019_v31, %v1617_v29  ;;  %1040 = vtanh.f32 %v1672_v18  ;;  %v1732_v16 = vmul.f32 0.5, %v149_v2 }
  0x89   :  { %v1023_v42 = vpop.eup %1022  ;;  %763 = vst [vmem:[#allocation5 + $0x320] sm:$0xff] %v635_v19  ;;  %v637_v23 = vadd.f32 %v509_v34, %v1612_v27  ;;  %v511_v44 = vmul.f32 %v1021_v37, %v1622_v32  ;;  %1042 = vtanh.f32 %v1677_v26  ;;  %v1737_v22 = vmul.f32 0.5, %v150_v7 }
  0x8a   :  { %v1025_v47 = vpop.eup %1024  ;;  %764 = vst [vmem:[#allocation5 + $0x328] sm:$0xff] %v636_v21  ;;  %v638_v25 = vadd.f32 %v510_v39, %v1617_v29  ;;  %v512_v49 = vmul.f32 %v1023_v42, %v1627_v36  ;;  %1044 = vtanh.f32 %v1682_v33 }
  0x8b   :  { %v1027_v52 = vpop.eup %1026  ;;  %765 = vst [vmem:[#allocation5 + $0x330] sm:$0xff] %v637_v23  ;;  %v639_v27 = vadd.f32 %v511_v44, %v1622_v32  ;;  %v513_v54 = vmul.f32 %v1025_v47, %v1632_v40  ;;  %1046 = vtanh.f32 %v1687_v38 }
  0x8c   :  { %v1029_v57 = vpop.eup %1028  ;;  %766 = vst [vmem:[#allocation5 + $0x338] sm:$0xff] %v638_v25  ;;  %v640_v29 = vadd.f32 %v512_v49, %v1627_v36  ;;  %v514_v59 = vmul.f32 %v1027_v52, %v1637_v45  ;;  %1048 = vtanh.f32 %v1692_v43 }
  0x8d   :  { %v1031_v62 = vpop.eup %1030  ;;  %767 = vst [vmem:[#allocation5 + $0x340] sm:$0xff] %v639_v27  ;;  %v641_v32 = vadd.f32 %v513_v54, %v1632_v40  ;;  %v515_v0 = vmul.f32 %v1029_v57, %v1642_v50  ;;  %1050 = vtanh.f32 %v1697_v48 }
  0x8e   :  { %v1033_v3 = vpop.eup %1032  ;;  %768 = vst [vmem:[#allocation5 + $0x348] sm:$0xff] %v640_v29  ;;  %v642_v36 = vadd.f32 %v514_v59, %v1637_v45  ;;  %v516_v5 = vmul.f32 %v1031_v62, %v1647_v55  ;;  %1052 = vtanh.f32 %v1702_v53 }
  0x8f   :  { %v1035_v8 = vpop.eup %1034  ;;  %769 = vst [vmem:[#allocation5 + $0x350] sm:$0xff] %v641_v32  ;;  %v643_v40 = vadd.f32 %v515_v0, %v1642_v50  ;;  %v517_v10 = vmul.f32 %v1033_v3, %v1652_v60  ;;  %1054 = vtanh.f32 %v1707_v58 }
  0x90   :  { %v1037_v12 = vpop.eup %1036  ;;  %770 = vst [vmem:[#allocation5 + $0x358] sm:$0xff] %v642_v36  ;;  %v644_v45 = vadd.f32 %v516_v5, %v1647_v55  ;;  %v518_v14 = vmul.f32 %v1035_v8, %v1657_v1  ;;  %1056 = vtanh.f32 %v1712_v63 }
  0x91   :  { %v1039_v15 = vpop.eup %1038  ;;  %771 = vst [vmem:[#allocation5 + $0x360] sm:$0xff] %v643_v40  ;;  %v645_v50 = vadd.f32 %v517_v10, %v1652_v60  ;;  %v519_v20 = vmul.f32 %v1037_v12, %v1662_v6  ;;  %1058 = vtanh.f32 %v1717_v4 }
  0x92   :  { %v1041_v24 = vpop.eup %1040  ;;  %772 = vst [vmem:[#allocation5 + $0x368] sm:$0xff] %v644_v45  ;;  %v646_v55 = vadd.f32 %v518_v14, %v1657_v1  ;;  %v520_v17 = vmul.f32 %v1039_v15, %v1667_v11  ;;  %1060 = vtanh.f32 %v1722_v9 }
  0x93   :  { %v1043_v28 = vpop.eup %1042  ;;  %773 = vst [vmem:[#allocation5 + $0x370] sm:$0xff] %v645_v50  ;;  %v647_v30 = vadd.f32 %v519_v20, %v1662_v6  ;;  %v521_v60 = vmul.f32 %v1041_v24, %v1672_v18  ;;  %1062 = vtanh.f32 %v1727_v13 }
  0x94   :  { %v1045_v31 = vpop.eup %1044  ;;  %774 = vst [vmem:[#allocation5 + $0x378] sm:$0xff] %v646_v55  ;;  %v648_v19 = vadd.f32 %v520_v17, %v1667_v11  ;;  %v522_v34 = vmul.f32 %v1043_v28, %v1677_v26  ;;  %1064 = vtanh.f32 %v1732_v16 }
  0x95   :  { %v1047_v1 = vpop.eup %1046  ;;  %775 = vst [vmem:[#allocation5 + $0x380] sm:$0xff] %v647_v30  ;;  %v649_v35 = vadd.f32 %v521_v60, %v1672_v18  ;;  %v523_v37 = vmul.f32 %v1045_v31, %v1682_v33  ;;  %1066 = vtanh.f32 %v1737_v22 }
  0x96   :  { %v1049_v6 = vpop.eup %1048  ;;  %776 = vst [vmem:[#allocation5 + $0x388] sm:$0xff] %v648_v19  ;;  %v650_v21 = vadd.f32 %v522_v34, %v1677_v26  ;;  %v524_v39 = vmul.f32 %v1047_v1, %v1687_v38 }
  0x97   :  { %v1051_v41 = vpop.eup %1050  ;;  %777 = vst [vmem:[#allocation5 + $0x390] sm:$0xff] %v649_v35  ;;  %v651_v11 = vadd.f32 %v523_v37, %v1682_v33  ;;  %v525_v42 = vmul.f32 %v1049_v6, %v1692_v43 }
  0x98   :  { %v1053_v23 = vpop.eup %1052  ;;  %778 = vst [vmem:[#allocation5 + $0x398] sm:$0xff] %v650_v21  ;;  %v652_v18 = vadd.f32 %v524_v39, %v1687_v38  ;;  %v526_v44 = vmul.f32 %v1051_v41, %v1697_v48 }
  0x99   :  { %v1055_v46 = vpop.eup %1054  ;;  %779 = vst [vmem:[#allocation5 + $0x3a0] sm:$0xff] %v651_v11  ;;  %v653_v47 = vadd.f32 %v525_v42, %v1692_v43  ;;  %v527_v26 = vmul.f32 %v1053_v23, %v1702_v53 }
  0x9a   :  { %v1057_v25 = vpop.eup %1056  ;;  %780 = vst [vmem:[#allocation5 + $0x3a8] sm:$0xff] %v652_v18  ;;  %v654_v49 = vadd.f32 %v526_v44, %v1697_v48  ;;  %v528_v33 = vmul.f32 %v1055_v46, %v1707_v58 }
  0x9b   :  { %v1059_v51 = vpop.eup %1058  ;;  %781 = vst [vmem:[#allocation5 + $0x3b0] sm:$0xff] %v653_v47  ;;  %v655_v52 = vadd.f32 %v527_v26, %v1702_v53  ;;  %v529_v38 = vmul.f32 %v1057_v25, %v1712_v63 }
  0x9c   :  { %v1061_v27 = vpop.eup %1060  ;;  %782 = vst [vmem:[#allocation5 + $0x3b8] sm:$0xff] %v654_v49  ;;  %v656_v54 = vadd.f32 %v528_v33, %v1707_v58  ;;  %v530_v43 = vmul.f32 %v1059_v51, %v1717_v4 }
  0x9d   :  { %v1063_v56 = vpop.eup %1062  ;;  %783 = vst [vmem:[#allocation5 + $0x3c0] sm:$0xff] %v655_v52  ;;  %v657_v57 = vadd.f32 %v529_v38, %v1712_v63  ;;  %v531_v48 = vmul.f32 %v1061_v27, %v1722_v9 }
  0x9e   :  { %v1065_v29 = vpop.eup %1064  ;;  %784 = vst [vmem:[#allocation5 + $0x3c8] sm:$0xff] %v656_v54  ;;  %v658_v59 = vadd.f32 %v530_v43, %v1717_v4  ;;  %v532_v53 = vmul.f32 %v1063_v56, %v1727_v13 }
  0x9f   :  { %v1067_v61 = vpop.eup %1066  ;;  %785 = vst [vmem:[#allocation5 + $0x3d0] sm:$0xff] %v657_v57  ;;  %v659_v62 = vadd.f32 %v531_v48, %v1722_v9  ;;  %v533_v58 = vmul.f32 %v1065_v29, %v1732_v16 }
  0xa0   :  { %786 = vst [vmem:[#allocation5 + $0x3d8] sm:$0xff] %v658_v59  ;;  %v660_v32 = vadd.f32 %v532_v53, %v1727_v13  ;;  %v534_v63 = vmul.f32 %v1067_v61, %v1737_v22 }
  0xa1   :  { %787 = vst [vmem:[#allocation5 + $0x3e0] sm:$0xff] %v659_v62  ;;  %v661_v0 = vadd.f32 %v533_v58, %v1732_v16 }
  0xa2   :  { %788 = vst [vmem:[#allocation5 + $0x3e8] sm:$0xff] %v660_v32  ;;  %v662_v4 = vadd.f32 %v534_v63, %v1737_v22 }
  0xa3   :  { %789 = vst [vmem:[#allocation5 + $0x3f0] sm:$0xff] %v661_v0 }
  0xa4   :  { %790 = vst [vmem:[#allocation5 + $0x3f8] sm:$0xff] %v662_v4 }
  0xa5   :  { %1101 = shalt.err (!%p1098_p12)
}
  0xa6   :  { %s1102_s24 = scalar_lea.hbm %s1791_s1, 16384 }
  0xa7   :  { %p1103_p13 = scmp.ne.s32.totalorder %s1791_s1, %s1102_s24  ;;  %p1106_p0 = scmp.lt.u32.totalorder %s1102_s24, %s1791_s1 }
  0xa9   :  { %p1108_p1 = pnand %p1106_p0, %p1103_p13 }
  0xab   :  { %1111 = shalt.err (!%p1108_p1)
}
  0xac   :  { %802 = dma.vmem_to_hbm [thread:$0]  %s797_s20, 16384, %s1791_s1, [#allocation4], %s1117_s16, %s1117_s16, %s1118_s17  }
  0xad   :  { %1114 = dma.done.wait [#allocation4], 16384  }
  0xae   :  { %1115 = vsyncadd [#allocation4], 4294950912 }
  0xaf   :  { %806 = vsyncpa [#allocation3], 1 }
  0xb0   :  { %807 = vsyncpa [#allocation4], 1 }

</bundles_post_ra>
